<compile_context>
chip_gen: v7x
topology: tpu7x:2x2x1
jax: 0.10.0
libtpu: 0.0.40
codegen_flags: <defaults>
</compile_context>

<pallas_src>
import functools

import jax
import jax.numpy as jnp
from jax import lax
from jax.experimental import pallas as pl
from jax.experimental.pallas import tpu as pltpu


def _round_up(v, m):
    return (v + m - 1) // m * m


def _gelu_exact(x):
    # PyTorch nn.GELU() default = exact erf formulation (computed in f32).
    return 0.5 * x * (1.0 + lax.erf(x * jnp.float32(0.7071067811865476)))


def dnn_kernel(x_ref, w1_ref, b1_ref, w2_ref, b2_ref, w3_ref, b3_ref, o_ref):
    # fc1 -> (dropout = identity at eval) -> gelu
    h = jnp.dot(x_ref[...], w1_ref[...], preferred_element_type=jnp.float32)
    h = _gelu_exact(h + b1_ref[...])
    # fc2 -> (dropout = identity at eval) -> gelu
    h = jnp.dot(h.astype(jnp.bfloat16), w2_ref[...],
                preferred_element_type=jnp.float32)
    h = _gelu_exact(h + b2_ref[...])
    # fc3 -> gelu
    h = jnp.dot(h.astype(jnp.bfloat16), w3_ref[...],
                preferred_element_type=jnp.float32)
    h = _gelu_exact(h + b3_ref[...])
    o_ref[...] = h.astype(o_ref.dtype)


def _pad2(a, rows, cols):
    return jnp.pad(a, ((0, rows - a.shape[0]), (0, cols - a.shape[1])))


@functools.partial(jax.jit, static_argnames=("block_rows",))
def dnn_forward(x, w1, b1, w2, b2, w3, b3, *, block_rows=512):
    """Fused 3-layer MLP with exact-erf GELU (dropout disabled, eval mode)."""
    n, d_in = x.shape
    l1 = w1.shape[1]
    l2 = w2.shape[1]
    d_out = w3.shape[1]

    # ---- pad feature dims to 128 (lane-dense MXU tiles / unmasked vst) ----
    d_in_p, l1_p, l2_p, d_out_p = (
        _round_up(d, 128) for d in (d_in, l1, l2, d_out)
    )

    # ---- derive a row tile that fits a conservative per-TC VMEM budget ----
    bf16, f32 = 2, 4
    weight_bytes = bf16 * (d_in_p * l1_p + l1_p * l2_p + l2_p * d_out_p)
    bias_bytes = f32 * (l1_p + l2_p + d_out_p)

    def _footprint(br):
        x_tile = bf16 * br * d_in_p          # streamed input tile
        o_tile = f32 * br * d_out_p          # streamed output tile
        act = f32 * br * max(l1_p, l2_p)     # in-kernel f32 intermediates
        # x/out tiles and the (grid-invariant) weights/biases are all
        # double-buffered by the default BlockSpec pipeline -> budget 2x each.
        return 2 * (x_tile + o_tile) + 2 * (weight_bytes + bias_bytes) + 2 * act

    vmem_budget = 28 << 20   # safe on v5e/v6e (128 MiB) and v7x (64 MiB/TC)
    br = _round_up(max(16, min(block_rows, n)), 16)
    while br > 16 and _footprint(br) > vmem_budget:
        br = _round_up(br // 2, 16)

    n_p = _round_up(n, br)
    grid = (n_p // br,)

    # ---- pad + cast operands (zero padding keeps padded lanes exactly 0:
    # GELU(0 + 0) = 0 and padded rows of w2/w3 are 0, so no garbage flows) ----
    x_p = _pad2(x, n_p, d_in_p).astype(jnp.bfloat16)
    w1p = _pad2(w1, d_in_p, l1_p).astype(jnp.bfloat16)
    w2p = _pad2(w2, l1_p, l2_p).astype(jnp.bfloat16)
    w3p = _pad2(w3, l2_p, d_out_p).astype(jnp.bfloat16)
    b1p = jnp.pad(b1, (0, l1_p - l1)).reshape(1, l1_p).astype(jnp.float32)
    b2p = jnp.pad(b2, (0, l2_p - l2)).reshape(1, l2_p).astype(jnp.float32)
    b3p = jnp.pad(b3, (0, d_out_p - d_out)).reshape(1, d_out_p).astype(jnp.float32)

    cost = pl.CostEstimate(
        flops=2 * n_p * (d_in_p * l1_p + l1_p * l2_p + l2_p * d_out_p),
        transcendentals=n_p * (l1_p + l2_p + d_out_p),
        bytes_accessed=(n_p * d_in_p * bf16 + n_p * d_out_p * f32
                        + weight_bytes + bias_bytes),
    )

    out_p = pl.pallas_call(
        dnn_kernel,
        out_shape=jax.ShapeDtypeStruct((n_p, d_out_p), jnp.float32),
        grid_spec=pltpu.PrefetchScalarGridSpec(
            num_scalar_prefetch=0,
            grid=grid,
            in_specs=[
                pl.BlockSpec((br, d_in_p), lambda i: (i, 0)),
                pl.BlockSpec((d_in_p, l1_p), lambda i: (0, 0)),
                pl.BlockSpec((1, l1_p), lambda i: (0, 0)),
                pl.BlockSpec((l1_p, l2_p), lambda i: (0, 0)),
                pl.BlockSpec((1, l2_p), lambda i: (0, 0)),
                pl.BlockSpec((l2_p, d_out_p), lambda i: (0, 0)),
                pl.BlockSpec((1, d_out_p), lambda i: (0, 0)),
            ],
            out_specs=pl.BlockSpec((br, d_out_p), lambda i: (i, 0)),
        ),
        compiler_params=pltpu.CompilerParams(
            dimension_semantics=("parallel",),
            vmem_limit_bytes=min(max(_footprint(br) + (8 << 20), 32 << 20),
                                 48 << 20),
        ),
        cost_estimate=cost,
    )(x_p, w1p, b1p, w2p, b2p, w3p, b3p)

    # strip row / feature padding
    return out_p[:n, :d_out]


def init_linear_params(key, in_dim, out_dim, dtype=jnp.float32):
    # Mimic torch.nn.Linear default init: U(-1/sqrt(fan_in), 1/sqrt(fan_in)).
    kw, kb = jax.random.split(key)
    bound = 1.0 / jnp.sqrt(jnp.asarray(in_dim, dtype))
    w = jax.random.uniform(kw, (out_dim, in_dim), dtype, -bound, bound)
    b = jax.random.uniform(kb, (out_dim,), dtype, -bound, bound)
    # store transposed (in_dim, out_dim) for the kernel
    return w.T, b


def _gelu_ref(v):
    return 0.5 * v * (1.0 + lax.erf(v / jnp.sqrt(2.0)))


def reference_forward_mixed(x, w1, b1, w2, b2, w3, b3):
    # Mirrors the kernel's mixed precision: bf16 matmul operands, f32 accum.
    bf = jnp.bfloat16
    h = _gelu_ref(jnp.dot(x.astype(bf), w1.astype(bf),
                          preferred_element_type=jnp.float32) + b1)
    h = _gelu_ref(jnp.dot(h.astype(bf), w2.astype(bf),
                          preferred_element_type=jnp.float32) + b2)
    h = _gelu_ref(jnp.dot(h.astype(bf), w3.astype(bf),
                          preferred_element_type=jnp.float32) + b3)
    return h


def reference_forward_f32(x, w1, b1, w2, b2, w3, b3):
    h = _gelu_ref(x @ w1 + b1)
    h = _gelu_ref(h @ w2 + b2)
    return _gelu_ref(h @ w3 + b3)


if __name__ == "__main__":
    # DNN(input_dims=32, L1=64, L2=64, target_dims=32, ...) at small sizes.
    batch = 8
    input_dims, L1, L2, target_dims = 32, 64, 64, 32

    key = jax.random.PRNGKey(0)
    kx, k1, k2, k3 = jax.random.split(key, 4)
    x = jax.random.normal(kx, (batch, input_dims), jnp.float32)
    w1, b1 = init_linear_params(k1, input_dims, L1)
    w2, b2 = init_linear_params(k2, L1, L2)
    w3, b3 = init_linear_params(k3, L2, target_dims)

    out = dnn_forward(x, w1, b1, w2, b2, w3, b3)
    out = jax.block_until_ready(out)
    assert out.shape == (batch, target_dims)

    ref_mixed = reference_forward_mixed(x, w1, b1, w2, b2, w3, b3)
    assert jnp.allclose(out, ref_mixed, atol=2e-3, rtol=2e-3), \
        "mismatch vs mixed-precision reference"

    ref_f32 = reference_forward_f32(x, w1, b1, w2, b2, w3, b3)
    assert jnp.allclose(out, ref_f32, atol=5e-2, rtol=5e-2), \
        "mismatch vs f32 reference"

    print("KERNEL_OK")
</pallas_src>

<mosaic_0001>
module attributes {stable_mosaic.version = 11 : i64} {
  func.func @dnn_kernel(%arg0: i32, %arg1: memref<16x128xbf16, #tpu.memory_space<vmem>>, %arg2: memref<128x128xbf16, #tpu.memory_space<vmem>>, %arg3: memref<1x128xf32, #tpu.memory_space<vmem>>, %arg4: memref<128x128xbf16, #tpu.memory_space<vmem>>, %arg5: memref<1x128xf32, #tpu.memory_space<vmem>>, %arg6: memref<128x128xbf16, #tpu.memory_space<vmem>>, %arg7: memref<1x128xf32, #tpu.memory_space<vmem>>, %arg8: memref<16x128xf32, #tpu.memory_space<vmem>>) attributes {dimension_semantics = [#tpu.dimension_semantics<parallel>], iteration_bounds = array<i64: 1>, scalar_prefetch = 0 : i64, scratch_operands = 0 : i64, tpu.core_type = #tpu.core_type<tc>, window_params = [{transform_indices = @transform_0, window_bounds = array<i64: 16, 128>}, {pipeline_mode = #tpu.pipeline_mode<synchronous>, transform_indices = @transform_1, window_bounds = array<i64: 128, 128>}, {pipeline_mode = #tpu.pipeline_mode<synchronous>, transform_indices = @transform_2, window_bounds = array<i64: 1, 128>}, {pipeline_mode = #tpu.pipeline_mode<synchronous>, transform_indices = @transform_3, window_bounds = array<i64: 128, 128>}, {pipeline_mode = #tpu.pipeline_mode<synchronous>, transform_indices = @transform_4, window_bounds = array<i64: 1, 128>}, {pipeline_mode = #tpu.pipeline_mode<synchronous>, transform_indices = @transform_5, window_bounds = array<i64: 128, 128>}, {pipeline_mode = #tpu.pipeline_mode<synchronous>, transform_indices = @transform_6, window_bounds = array<i64: 1, 128>}, {transform_indices = @transform_7, window_bounds = array<i64: 16, 128>}]} {
    %c0 = arith.constant 0 : index
    %c0_0 = arith.constant 0 : index
    %0 = vector.load %arg1[%c0, %c0_0] : memref<16x128xbf16, #tpu.memory_space<vmem>>, vector<16x128xbf16>
    %c0_1 = arith.constant 0 : index
    %c0_2 = arith.constant 0 : index
    %1 = vector.load %arg2[%c0_1, %c0_2] : memref<128x128xbf16, #tpu.memory_space<vmem>>, vector<128x128xbf16>
    %cst = arith.constant dense<0.000000e+00> : vector<16x128xf32>
    %2 = tpu.matmul %0, %1, %cst {dimension_numbers = #tpu.dot_dimension_numbers<[1], [0], [0], [1], [0, 0, 1, 1], [], []>} : vector<16x128xbf16>, vector<128x128xbf16>, vector<16x128xf32> -> vector<16x128xf32>
    %c0_3 = arith.constant 0 : index
    %c0_4 = arith.constant 0 : index
    %3 = vector.load %arg3[%c0_3, %c0_4] : memref<1x128xf32, #tpu.memory_space<vmem>>, vector<1x128xf32>
    %4 = vector.broadcast %3 : vector<1x128xf32> to vector<16x128xf32>
    %5 = arith.addf %2, %4 : vector<16x128xf32>
    %cst_5 = arith.constant 5.000000e-01 : f32
    %6 = vector.broadcast %cst_5 : f32 to vector<16x128xf32>
    %7 = arith.mulf %6, %5 : vector<16x128xf32>
    %cst_6 = arith.constant 0.707106769 : f32
    %8 = vector.broadcast %cst_6 : f32 to vector<16x128xf32>
    %9 = arith.mulf %5, %8 : vector<16x128xf32>
    %10 = math.erf %9 : vector<16x128xf32>
    %cst_7 = arith.constant 1.000000e+00 : f32
    %11 = vector.broadcast %cst_7 : f32 to vector<16x128xf32>
    %12 = arith.addf %11, %10 : vector<16x128xf32>
    %13 = arith.mulf %7, %12 : vector<16x128xf32>
    %14 = arith.truncf %13 : vector<16x128xf32> to vector<16x128xbf16>
    %c0_8 = arith.constant 0 : index
    %c0_9 = arith.constant 0 : index
    %15 = vector.load %arg4[%c0_8, %c0_9] : memref<128x128xbf16, #tpu.memory_space<vmem>>, vector<128x128xbf16>
    %cst_10 = arith.constant dense<0.000000e+00> : vector<16x128xf32>
    %16 = tpu.matmul %14, %15, %cst_10 {dimension_numbers = #tpu.dot_dimension_numbers<[1], [0], [0], [1], [0, 0, 1, 1], [], []>} : vector<16x128xbf16>, vector<128x128xbf16>, vector<16x128xf32> -> vector<16x128xf32>
    %c0_11 = arith.constant 0 : index
    %c0_12 = arith.constant 0 : index
    %17 = vector.load %arg5[%c0_11, %c0_12] : memref<1x128xf32, #tpu.memory_space<vmem>>, vector<1x128xf32>
    %18 = vector.broadcast %17 : vector<1x128xf32> to vector<16x128xf32>
    %19 = arith.addf %16, %18 : vector<16x128xf32>
    %cst_13 = arith.constant 5.000000e-01 : f32
    %20 = vector.broadcast %cst_13 : f32 to vector<16x128xf32>
    %21 = arith.mulf %20, %19 : vector<16x128xf32>
    %cst_14 = arith.constant 0.707106769 : f32
    %22 = vector.broadcast %cst_14 : f32 to vector<16x128xf32>
    %23 = arith.mulf %19, %22 : vector<16x128xf32>
    %24 = math.erf %23 : vector<16x128xf32>
    %cst_15 = arith.constant 1.000000e+00 : f32
    %25 = vector.broadcast %cst_15 : f32 to vector<16x128xf32>
    %26 = arith.addf %25, %24 : vector<16x128xf32>
    %27 = arith.mulf %21, %26 : vector<16x128xf32>
    %28 = arith.truncf %27 : vector<16x128xf32> to vector<16x128xbf16>
    %c0_16 = arith.constant 0 : index
    %c0_17 = arith.constant 0 : index
    %29 = vector.load %arg6[%c0_16, %c0_17] : memref<128x128xbf16, #tpu.memory_space<vmem>>, vector<128x128xbf16>
    %cst_18 = arith.constant dense<0.000000e+00> : vector<16x128xf32>
    %30 = tpu.matmul %28, %29, %cst_18 {dimension_numbers = #tpu.dot_dimension_numbers<[1], [0], [0], [1], [0, 0, 1, 1], [], []>} : vector<16x128xbf16>, vector<128x128xbf16>, vector<16x128xf32> -> vector<16x128xf32>
    %c0_19 = arith.constant 0 : index
    %c0_20 = arith.constant 0 : index
    %31 = vector.load %arg7[%c0_19, %c0_20] : memref<1x128xf32, #tpu.memory_space<vmem>>, vector<1x128xf32>
    %32 = vector.broadcast %31 : vector<1x128xf32> to vector<16x128xf32>
    %33 = arith.addf %30, %32 : vector<16x128xf32>
    %cst_21 = arith.constant 5.000000e-01 : f32
    %34 = vector.broadcast %cst_21 : f32 to vector<16x128xf32>
    %35 = arith.mulf %34, %33 : vector<16x128xf32>
    %cst_22 = arith.constant 0.707106769 : f32
    %36 = vector.broadcast %cst_22 : f32 to vector<16x128xf32>
    %37 = arith.mulf %33, %36 : vector<16x128xf32>
    %38 = math.erf %37 : vector<16x128xf32>
    %cst_23 = arith.constant 1.000000e+00 : f32
    %39 = vector.broadcast %cst_23 : f32 to vector<16x128xf32>
    %40 = arith.addf %39, %38 : vector<16x128xf32>
    %41 = arith.mulf %35, %40 : vector<16x128xf32>
    %c0_24 = arith.constant 0 : index
    %c0_25 = arith.constant 0 : index
    %42 = vector.load %arg8[%c0_24, %c0_25] : memref<16x128xf32, #tpu.memory_space<vmem>>, vector<16x128xf32>
    tpu.vector_store %arg8[%c0_24, %c0_25], %41 {strides = array<i32>} : memref<16x128xf32, #tpu.memory_space<vmem>>, vector<16x128xf32>,
    return
  }
  func.func @transform_0(%arg0: i32) -> (i32, i32) {
    %c0_i32 = arith.constant 0 : i32
    %c0_i32_0 = arith.constant 0 : i32
    return %arg0, %c0_i32 : i32, i32
  }
  func.func @transform_1(%arg0: i32) -> (i32, i32) {
    %c0_i32 = arith.constant 0 : i32
    %c0_i32_0 = arith.constant 0 : i32
    %c0_i32_1 = arith.constant 0 : i32
    return %c0_i32, %c0_i32_0 : i32, i32
  }
  func.func @transform_2(%arg0: i32) -> (i32, i32) {
    %c0_i32 = arith.constant 0 : i32
    %c0_i32_0 = arith.constant 0 : i32
    %c0_i32_1 = arith.constant 0 : i32
    return %c0_i32, %c0_i32_0 : i32, i32
  }
  func.func @transform_3(%arg0: i32) -> (i32, i32) {
    %c0_i32 = arith.constant 0 : i32
    %c0_i32_0 = arith.constant 0 : i32
    %c0_i32_1 = arith.constant 0 : i32
    return %c0_i32, %c0_i32_0 : i32, i32
  }
  func.func @transform_4(%arg0: i32) -> (i32, i32) {
    %c0_i32 = arith.constant 0 : i32
    %c0_i32_0 = arith.constant 0 : i32
    %c0_i32_1 = arith.constant 0 : i32
    return %c0_i32, %c0_i32_0 : i32, i32
  }
  func.func @transform_5(%arg0: i32) -> (i32, i32) {
    %c0_i32 = arith.constant 0 : i32
    %c0_i32_0 = arith.constant 0 : i32
    %c0_i32_1 = arith.constant 0 : i32
    return %c0_i32, %c0_i32_0 : i32, i32
  }
  func.func @transform_6(%arg0: i32) -> (i32, i32) {
    %c0_i32 = arith.constant 0 : i32
    %c0_i32_0 = arith.constant 0 : i32
    %c0_i32_1 = arith.constant 0 : i32
    return %c0_i32, %c0_i32_0 : i32, i32
  }
  func.func @transform_7(%arg0: i32) -> (i32, i32) {
    %c0_i32 = arith.constant 0 : i32
    %c0_i32_0 = arith.constant 0 : i32
    return %arg0, %c0_i32 : i32, i32
  }
}

</mosaic_0001>

<bundles_post_ra>
// kernel: dnn_forward.1
= control target key start
LH: loop header
LB: loop body
LE: loop exit
PB: predicated region body
PF: predicated region fallthrough
CT: control target
= control target key end

     0   :  { %v563_v0 = vmov 0.0   ;;  %vm564_vm0 = vmmov 0   ;;  %s725_s1 = inlined_call_operand.vmem [shape: bf16[128,128], index: 1, kind: input, shape index: {}]   ;;  %s726_s3 = inlined_call_operand.vmem [shape: bf16[128,128], index: 3, kind: input, shape index: {}]   ;;  %s727_s0 = inlined_call_operand.vmem [shape: bf16[16,128], index: 0, kind: input, shape index: {}]   ;;  %s728_s5 = inlined_call_operand.vmem [shape: bf16[128,128], index: 5, kind: input, shape index: {}]   ;;  %s729_s2 = inlined_call_operand.vmem [shape: f32[1,128], index: 2, kind: input, shape index: {}]   ;;  %s730_s4 = inlined_call_operand.vmem [shape: f32[1,128], index: 4, kind: input, shape index: {}]   ;;  %s731_s6 = inlined_call_operand.vmem [shape: f32[1,128], index: 6, kind: input, shape index: {}]   ;;  %s732_s7 = inlined_call_operand.vmem [shape: f32[16,128], index: 7, kind: output, shape index: {}]  }
   0x1   :  { %464 = vmatprep.subr.bf16.mxu0 %v563_v0  ;;  %v526_v1 = vld [vmem:[%s725_s1] sm:$0xff]   ;;  %480 = vmatprep.mubr.msk.bf16.mxu0 %vm564_vm0, %v563_v0  ;;  %v527_v2 = vld [vmem:[%s725_s1 + $0x8] sm:$0xff]   ;;  %v528_v3 = vld [vmem:[%s725_s1 + $0x10] sm:$0xff]  }
   0x2   :  { %484 = vmatprep.subr.bf16.mxu1 %v563_v0  ;;  %500 = vmatprep.mubr.msk.bf16.mxu1 %vm564_vm0, %v563_v0  ;;  %v535_v4 = vld [vmem:[%s726_s3] sm:$0xff]   ;;  %v529_v5 = vld [vmem:[%s725_s1 + $0x18] sm:$0xff]   ;;  %v536_v6 = vld [vmem:[%s726_s3 + $0x8] sm:$0xff]  }
   0x3   :  { %465 = vmatpush3.bf16.msra.mxu0 %v526_v1  ;;  %485 = vmatpush3.bf16.msra.mxu1 %v535_v4  ;;  %v530_v7 = vld [vmem:[%s725_s1 + $0x20] sm:$0xff]   ;;  %v531_v8 = vld [vmem:[%s725_s1 + $0x28] sm:$0xff]   ;;  %v532_v9 = vld [vmem:[%s725_s1 + $0x30] sm:$0xff]  }
   0x4   :  { %466 = vmatprep.subr.bf16.mxu0 %v563_v0  ;;  %486 = vmatprep.subr.bf16.mxu1 %v563_v0  ;;  %v533_v10 = vld [vmem:[%s725_s1 + $0x38] sm:$0xff]   ;;  %v534_v11 = vld [vmem:[%s727_s0] sm:$0xff]   ;;  %v537_v12 = vld [vmem:[%s726_s3 + $0x10] sm:$0xff]  }
   0x5   :  { %v538_v13 = vld [vmem:[%s726_s3 + $0x18] sm:$0xff]   ;;  %v539_v14 = vld [vmem:[%s726_s3 + $0x20] sm:$0xff]   ;;  %v540_v15 = vld [vmem:[%s726_s3 + $0x28] sm:$0xff]  }
   0x6   :  { %v541_v16 = vld [vmem:[%s726_s3 + $0x30] sm:$0xff]   ;;  %v542_v17 = vld [vmem:[%s726_s3 + $0x38] sm:$0xff]   ;;  %v543_v18 = vld [vmem:[%s728_s5] sm:$0xff]  }
   0x7   :  { %467 = vmatpush3.bf16.msra.mxu0 %v527_v2  ;;  %487 = vmatpush3.bf16.msra.mxu1 %v536_v6  ;;  %v544_v19 = vld [vmem:[%s728_s5 + $0x8] sm:$0xff]   ;;  %v409_v20 = vld [vmem:[%s729_s2] ss:$0 sm:$0xff]  ;;  %v545_v38 = vld [vmem:[%s728_s5 + $0x10] sm:$0xff]  }
   0x8   :  { %468 = vmatprep.subr.bf16.mxu0 %v563_v0  ;;  %488 = vmatprep.subr.bf16.mxu1 %v563_v0  ;;  %v546_v39 = vld [vmem:[%s728_s5 + $0x18] sm:$0xff]   ;;  %v547_v40 = vld [vmem:[%s728_s5 + $0x20] sm:$0xff]   ;;  %v548_v41 = vld [vmem:[%s728_s5 + $0x28] sm:$0xff]  }
   0x9   :  { %v549_v42 = vld [vmem:[%s728_s5 + $0x30] sm:$0xff]   ;;  %v550_v43 = vld [vmem:[%s728_s5 + $0x38] sm:$0xff]   ;;  %v419_v44 = vld [vmem:[%s730_s4] ss:$0 sm:$0xff] }
   0xa   :  { %v428_v62 = vld [vmem:[%s731_s6] ss:$0 sm:$0xff] }
   0xb   :  { %469 = vmatpush3.bf16.msra.mxu0 %v528_v3  ;;  %489 = vmatpush3.bf16.msra.mxu1 %v537_v12 }
   0xc   :  { %470 = vmatprep.subr.bf16.mxu0 %v563_v0  ;;  %490 = vmatprep.subr.bf16.mxu1 %v563_v0 }
   0xf   :  { %471 = vmatpush3.bf16.msra.mxu0 %v529_v5  ;;  %491 = vmatpush3.bf16.msra.mxu1 %v538_v13 }
  0x10   :  { %472 = vmatprep.subr.bf16.mxu0 %v563_v0  ;;  %492 = vmatprep.subr.bf16.mxu1 %v563_v0 }
  0x13   :  { %473 = vmatpush3.bf16.msra.mxu0 %v530_v7  ;;  %493 = vmatpush3.bf16.msra.mxu1 %v539_v14 }
  0x14   :  { %474 = vmatprep.subr.bf16.mxu0 %v563_v0  ;;  %494 = vmatprep.subr.bf16.mxu1 %v563_v0 }
  0x17   :  { %475 = vmatpush3.bf16.msra.mxu0 %v531_v8  ;;  %495 = vmatpush3.bf16.msra.mxu1 %v540_v15 }
  0x18   :  { %476 = vmatprep.subr.bf16.mxu0 %v563_v0  ;;  %496 = vmatprep.subr.bf16.mxu1 %v563_v0 }
  0x1b   :  { %477 = vmatpush3.bf16.msra.mxu0 %v532_v9  ;;  %497 = vmatpush3.bf16.msra.mxu1 %v541_v16 }
  0x1c   :  { %478 = vmatprep.subr.bf16.mxu0 %v563_v0  ;;  %498 = vmatprep.subr.bf16.mxu1 %v563_v0 }
  0x1f   :  { %479 = vmatpush3.bf16.msra.mxu0 %v533_v10  ;;  %499 = vmatpush3.bf16.msra.mxu1 %v542_v17 }
  0x20   :  { %504 = vmatprep.subr.bf16.mxu0 %v563_v0 }
  0x22   :  { %481 = vmatmul.mubr.bf16.vlgmr.msra.gmra.mrb[0].mxu0 %v534_v11 }
  0x23   :  { %520 = vmatprep.mubr.msk.bf16.mxu0 %vm564_vm0, %v563_v0  ;;  %505 = vmatpush3.bf16.msra.mxu0 %v543_v18 }
  0x24   :  { %506 = vmatprep.subr.bf16.mxu0 %v563_v0 }
  0x27   :  { %507 = vmatpush3.bf16.msra.mxu0 %v544_v19 }
  0x28   :  { %508 = vmatprep.subr.bf16.mxu0 %v563_v0 }
  0x2b   :  { %509 = vmatpush3.bf16.msra.mxu0 %v545_v38 }
  0x2c   :  { %510 = vmatprep.subr.bf16.mxu0 %v563_v0 }
  0x2f   :  { %511 = vmatpush3.bf16.msra.mxu0 %v546_v39 }
  0x30   :  { %512 = vmatprep.subr.bf16.mxu0 %v563_v0 }
  0x33   :  { %513 = vmatpush3.bf16.msra.mxu0 %v547_v40 }
  0x34   :  { %514 = vmatprep.subr.bf16.mxu0 %v563_v0 }
  0x37   :  { %515 = vmatpush3.bf16.msra.mxu0 %v548_v41 }
  0x38   :  { %516 = vmatprep.subr.bf16.mxu0 %v563_v0 }
  0x3b   :  { %517 = vmatpush3.bf16.msra.mxu0 %v549_v42 }
  0x3c   :  { %518 = vmatprep.subr.bf16.mxu0 %v563_v0 }
  0x3f   :  { %519 = vmatpush3.bf16.msra.mxu0 %v550_v43 }
  0xf5   :  { %v140_v21 = vpop.f32.mrb[0].mxu0 }
  0xf6   :  { %v141_v22 = vadd.f32 %v409_v20, %v140_v21  ;;  %v482_v23 = vpop.f32.mrb[1].mxu0 }
  0xf7   :  { %v143_v24 = vpop.f32.mrb[2].mxu0 }
  0xf8   :  { %v149_v25 = vmul.f32 0.70710677, %v141_v22  ;;  %v144_v26 = vadd.f32 %v409_v20, %v143_v24  ;;  %v483_v27 = vpop.f32.mrb[3].mxu0  ;;  %v147_v32 = vmul.f32 0.5, %v141_v22 }
  0xfa   :  { %551 = verf.f32 %v149_v25  ;;  %v150_v28 = vmul.f32 0.70710677, %v144_v26  ;;  %v148_v33 = vmul.f32 0.5, %v144_v26 }
  0xfc   :  { %553 = verf.f32 %v150_v28 }
 0x104   :  { %v552_v29 = vpop.eup %551 }
 0x105   :  { %v153_v30 = vadd.f32 1.0, %v552_v29 }
 0x106   :  { %v554_v31 = vpop.eup %553 }
 0x107   :  { %v154_v34 = vadd.f32 1.0, %v554_v31  ;;  %v155_v35 = vmul.f32 %v153_v30, %v147_v32 }
 0x109   :  { %v156_v36 = vmul.f32 %v154_v34, %v148_v33 }
 0x10b   :  { %v157_v37 = vpack.c.bf16 %v156_v36, %v155_v35 }
 0x10d   :  { %501 = vmatmul.mubr.bf16.vlgmr.msra.gmra.mrb[0].mxu1 %v157_v37 }
 0x1e0   :  { %v263_v45 = vpop.f32.mrb[0].mxu1 }
 0x1e1   :  { %v264_v46 = vadd.f32 %v419_v44, %v263_v45  ;;  %v502_v47 = vpop.f32.mrb[1].mxu1 }
 0x1e2   :  { %v266_v48 = vpop.f32.mrb[2].mxu1 }
 0x1e3   :  { %v272_v49 = vmul.f32 0.70710677, %v264_v46  ;;  %v267_v50 = vadd.f32 %v419_v44, %v266_v48  ;;  %v503_v51 = vpop.f32.mrb[3].mxu1  ;;  %v270_v56 = vmul.f32 0.5, %v264_v46 }
 0x1e5   :  { %555 = verf.f32 %v272_v49  ;;  %v273_v52 = vmul.f32 0.70710677, %v267_v50  ;;  %v271_v57 = vmul.f32 0.5, %v267_v50 }
 0x1e7   :  { %557 = verf.f32 %v273_v52 }
 0x1ef   :  { %v556_v53 = vpop.eup %555 }
 0x1f0   :  { %v276_v54 = vadd.f32 1.0, %v556_v53 }
 0x1f1   :  { %v558_v55 = vpop.eup %557 }
 0x1f2   :  { %v277_v58 = vadd.f32 1.0, %v558_v55  ;;  %v278_v59 = vmul.f32 %v276_v54, %v270_v56 }
 0x1f4   :  { %v279_v60 = vmul.f32 %v277_v58, %v271_v57 }
 0x1f6   :  { %v280_v61 = vpack.c.bf16 %v279_v60, %v278_v59 }
 0x1f8   :  { %521 = vmatmul.mubr.bf16.vlgmr.msra.gmra.mrb[4].mxu0 %v280_v61 }
 0x2cb   :  { %v386_v63 = vpop.f32.mrb[4].mxu0 }
 0x2cc   :  { %v387_v0 = vadd.f32 %v428_v62, %v386_v63  ;;  %v522_v1 = vpop.f32.mrb[5].mxu0 }
 0x2cd   :  { %v389_v2 = vpop.f32.mrb[6].mxu0 }
 0x2ce   :  { %v395_v3 = vmul.f32 0.70710677, %v387_v0  ;;  %v390_v4 = vadd.f32 %v428_v62, %v389_v2  ;;  %v523_v5 = vpop.f32.mrb[7].mxu0  ;;  %v393_v8 = vmul.f32 0.5, %v387_v0 }
 0x2d0   :  { %559 = verf.f32 %v395_v3  ;;  %v396_v6 = vmul.f32 0.70710677, %v390_v4  ;;  %v394_v12 = vmul.f32 0.5, %v390_v4 }
 0x2d2   :  { %561 = verf.f32 %v396_v6 }
 0x2da   :  { %v560_v7 = vpop.eup %559 }
 0x2db   :  { %v399_v9 = vadd.f32 1.0, %v560_v7 }
 0x2dc   :  { %v562_v10 = vpop.eup %561 }
 0x2dd   :  { %v401_v11 = vmul.f32 %v399_v9, %v393_v8  ;;  %v400_v13 = vadd.f32 1.0, %v562_v10 }
 0x2df   :  { %403 = vst [vmem:[%s732_s7] sm:$0xff] %v401_v11  ;;  %v402_v14 = vmul.f32 %v400_v13, %v394_v12 }
 0x2e1   :  { %404 = vst [vmem:[%s732_s7 + $0x8] sm:$0xff] %v402_v14 }

</bundles_post_ra>
